<compile_context>
chip_gen: v7x
topology: tpu7x:2x2x1
jax: 0.10.0
libtpu: 0.0.40
codegen_flags: <defaults>
</compile_context>

<pallas_src>
import jax
import jax.numpy as jnp
from jax.experimental import pallas as pl
from jax.experimental.pallas import tpu as pltpu


def mlp_kernel(x_ref, w1_ref, b1_ref, w2_ref, b2_ref, o_ref):
    # Linear(20, 256): MXU matmul in native dtype, f32 accumulate.
    h = jnp.dot(x_ref[...], w1_ref[...], preferred_element_type=jnp.float32)
    h = jnp.maximum(h + b1_ref[...], 0.0)        # bias + ReLU (VPU filler)
    # Linear(256, 10): cast hidden back to the weight dtype so the second
    # matmul also takes the native-precision MXU path (no-op for f32).
    h = h.astype(w2_ref.dtype)
    y = jnp.dot(h, w2_ref[...], preferred_element_type=jnp.float32) + b2_ref[...]
    o_ref[...] = y.astype(o_ref.dtype)


def prepare_params(w1, b1, w2, b2):
    """One-time parameter prep, hoisted out of the per-call forward."""
    return w1, b1.reshape(1, -1), w2, b2.reshape(1, -1)


def _choose_batch_tile(B, block_rows):
    """Pick a batch tile: big tiles for throughput, >=2 blocks for v7x megacore."""
    rows8 = pl.cdiv(B, 8) * 8                    # sublane multiple
    if rows8 <= 8:
        return 8                                 # tiny batch: one minimal tile
    if rows8 <= 2 * block_rows:
        # Split into (at least) two blocks so both v7x TensorCores get work.
        return pl.cdiv(pl.cdiv(rows8, 2), 8) * 8
    return block_rows


def mlp_forward(x, w1, b1_2d, w2, b2_2d, *, block_rows=4096):
    """Forward pass of MLP: out(relu(hidden(x))).

    x    : (B, D_in)
    w1   : (D_in, H),  b1_2d: (1, H)
    w2   : (H, D_out), b2_2d: (1, D_out)
    """
    B, D_in = x.shape
    H = w1.shape[1]
    D_out = w2.shape[1]

    TB = _choose_batch_tile(B, block_rows)
    n_blocks = pl.cdiv(B, TB)    # ragged final block: Pallas masks OOB writes

    itemsize = jnp.dtype(x.dtype).itemsize
    cost = pl.CostEstimate(
        flops=2 * B * (D_in * H + H * D_out),
        transcendentals=0,
        bytes_accessed=(B * D_in + D_in * H + H + H * D_out + D_out
                        + B * D_out) * itemsize,
    )

    return pl.pallas_call(
        mlp_kernel,
        out_shape=jax.ShapeDtypeStruct((B, D_out), x.dtype),
        grid=(n_blocks,),
        in_specs=[
            pl.BlockSpec((TB, D_in), lambda i: (i, 0)),    # x: tiled over batch
            pl.BlockSpec((D_in, H), lambda i: (0, 0)),     # W1: VMEM-resident
            pl.BlockSpec((1, H), lambda i: (0, 0)),        # b1
            pl.BlockSpec((H, D_out), lambda i: (0, 0)),    # W2
            pl.BlockSpec((1, D_out), lambda i: (0, 0)),    # b2
        ],
        out_specs=pl.BlockSpec((TB, D_out), lambda i: (i, 0)),
        compiler_params=pltpu.CompilerParams(
            dimension_semantics=("parallel",),    # megacore-shard batch axis
            vmem_limit_bytes=48 * 1024 * 1024,    # v5e scoped default is 16 MiB
        ),
        cost_estimate=cost,
    )(x, w1, b1_2d, w2, b2_2d)


def init_params(key, d_in=20, hidden=256, d_out=10, dtype=jnp.float32):
    """Deterministic init mimicking nn.Linear default (uniform +-1/sqrt(fan_in))."""
    k1, k2, k3, k4 = jax.random.split(key, 4)
    lim1 = 1.0 / jnp.sqrt(d_in)
    lim2 = 1.0 / jnp.sqrt(hidden)
    w1 = jax.random.uniform(k1, (d_in, hidden), dtype, -lim1, lim1)
    b1 = jax.random.uniform(k2, (hidden,), dtype, -lim1, lim1)
    w2 = jax.random.uniform(k3, (hidden, d_out), dtype, -lim2, lim2)
    b2 = jax.random.uniform(k4, (d_out,), dtype, -lim2, lim2)
    return w1, b1, w2, b2


if __name__ == "__main__":
    key = jax.random.PRNGKey(0)
    kx, kp = jax.random.split(key)

    # Matches `X = torch.rand(2, 20)` in the reference module.
    x = jax.random.uniform(kx, (2, 20), jnp.float32)
    w1, b1, w2, b2 = init_params(kp)

    # One-time parameter preparation (hoisted out of the forward).
    w1p, b1p, w2p, b2p = prepare_params(w1, b1, w2, b2)

    out = mlp_forward(x, w1p, b1p, w2p, b2p)
    out = jax.block_until_ready(out)

    # Pure-JAX reference of the same sequential forward.
    ref = jnp.maximum(x @ w1 + b1, 0.0) @ w2 + b2
    assert out.shape == (2, 10), out.shape
    assert jnp.allclose(out, ref, atol=1e-5, rtol=1e-5)

    print("KERNEL_OK")
</pallas_src>

<mosaic_0001>
module attributes {stable_mosaic.version = 11 : i64} {
  func.func @mlp_kernel(%arg0: i32, %arg1: memref<8x20xf32, #tpu.memory_space<vmem>>, %arg2: memref<20x256xf32, #tpu.memory_space<vmem>>, %arg3: memref<1x256xf32, #tpu.memory_space<vmem>>, %arg4: memref<256x10xf32, #tpu.memory_space<vmem>>, %arg5: memref<1x10xf32, #tpu.memory_space<vmem>>, %arg6: memref<8x10xf32, #tpu.memory_space<vmem>>) attributes {dimension_semantics = [#tpu.dimension_semantics<parallel>], iteration_bounds = array<i64: 1>, scalar_prefetch = 0 : i64, scratch_operands = 0 : i64, tpu.core_type = #tpu.core_type<tc>, window_params = [{transform_indices = @transform_0, window_bounds = array<i64: 8, 20>}, {pipeline_mode = #tpu.pipeline_mode<synchronous>, transform_indices = @transform_1, window_bounds = array<i64: 20, 256>}, {pipeline_mode = #tpu.pipeline_mode<synchronous>, transform_indices = @transform_2, window_bounds = array<i64: 1, 256>}, {pipeline_mode = #tpu.pipeline_mode<synchronous>, transform_indices = @transform_3, window_bounds = array<i64: 256, 10>}, {pipeline_mode = #tpu.pipeline_mode<synchronous>, transform_indices = @transform_4, window_bounds = array<i64: 1, 10>}, {transform_indices = @transform_5, window_bounds = array<i64: 8, 10>}]} {
    %c0 = arith.constant 0 : index
    %c0_0 = arith.constant 0 : index
    %0 = vector.load %arg1[%c0, %c0_0] : memref<8x20xf32, #tpu.memory_space<vmem>>, vector<8x20xf32>
    %c0_1 = arith.constant 0 : index
    %c0_2 = arith.constant 0 : index
    %1 = vector.load %arg2[%c0_1, %c0_2] : memref<20x256xf32, #tpu.memory_space<vmem>>, vector<20x256xf32>
    %cst = arith.constant dense<0.000000e+00> : vector<8x256xf32>
    %2 = tpu.matmul %0, %1, %cst {dimension_numbers = #tpu.dot_dimension_numbers<[1], [0], [0], [1], [0, 0, 1, 1], [], []>} : vector<8x20xf32>, vector<20x256xf32>, vector<8x256xf32> -> vector<8x256xf32>
    %c0_3 = arith.constant 0 : index
    %c0_4 = arith.constant 0 : index
    %3 = vector.load %arg3[%c0_3, %c0_4] : memref<1x256xf32, #tpu.memory_space<vmem>>, vector<1x256xf32>
    %4 = vector.broadcast %3 : vector<1x256xf32> to vector<8x256xf32>
    %5 = arith.addf %2, %4 : vector<8x256xf32>
    %cst_5 = arith.constant 0.000000e+00 : f32
    %6 = vector.broadcast %cst_5 : f32 to vector<8x256xf32>
    %7 = arith.maximumf %5, %6 : vector<8x256xf32>
    %c0_6 = arith.constant 0 : index
    %c0_7 = arith.constant 0 : index
    %8 = vector.load %arg4[%c0_6, %c0_7] : memref<256x10xf32, #tpu.memory_space<vmem>>, vector<256x10xf32>
    %cst_8 = arith.constant dense<0.000000e+00> : vector<8x10xf32>
    %9 = tpu.matmul %7, %8, %cst_8 {dimension_numbers = #tpu.dot_dimension_numbers<[1], [0], [0], [1], [0, 0, 1, 1], [], []>} : vector<8x256xf32>, vector<256x10xf32>, vector<8x10xf32> -> vector<8x10xf32>
    %c0_9 = arith.constant 0 : index
    %c0_10 = arith.constant 0 : index
    %10 = vector.load %arg5[%c0_9, %c0_10] : memref<1x10xf32, #tpu.memory_space<vmem>>, vector<1x10xf32>
    %11 = vector.broadcast %10 : vector<1x10xf32> to vector<8x10xf32>
    %12 = arith.addf %9, %11 : vector<8x10xf32>
    %c0_11 = arith.constant 0 : index
    %c0_12 = arith.constant 0 : index
    %13 = vector.load %arg6[%c0_11, %c0_12] : memref<8x10xf32, #tpu.memory_space<vmem>>, vector<8x10xf32>
    tpu.vector_store %arg6[%c0_11, %c0_12], %12 {strides = array<i32>} : memref<8x10xf32, #tpu.memory_space<vmem>>, vector<8x10xf32>,
    return
  }
  func.func @transform_0(%arg0: i32) -> (i32, i32) {
    %c0_i32 = arith.constant 0 : i32
    %c0_i32_0 = arith.constant 0 : i32
    return %arg0, %c0_i32 : i32, i32
  }
  func.func @transform_1(%arg0: i32) -> (i32, i32) {
    %c0_i32 = arith.constant 0 : i32
    %c0_i32_0 = arith.constant 0 : i32
    %c0_i32_1 = arith.constant 0 : i32
    return %c0_i32, %c0_i32_0 : i32, i32
  }
  func.func @transform_2(%arg0: i32) -> (i32, i32) {
    %c0_i32 = arith.constant 0 : i32
    %c0_i32_0 = arith.constant 0 : i32
    %c0_i32_1 = arith.constant 0 : i32
    return %c0_i32, %c0_i32_0 : i32, i32
  }
  func.func @transform_3(%arg0: i32) -> (i32, i32) {
    %c0_i32 = arith.constant 0 : i32
    %c0_i32_0 = arith.constant 0 : i32
    %c0_i32_1 = arith.constant 0 : i32
    return %c0_i32, %c0_i32_0 : i32, i32
  }
  func.func @transform_4(%arg0: i32) -> (i32, i32) {
    %c0_i32 = arith.constant 0 : i32
    %c0_i32_0 = arith.constant 0 : i32
    %c0_i32_1 = arith.constant 0 : i32
    return %c0_i32, %c0_i32_0 : i32, i32
  }
  func.func @transform_5(%arg0: i32) -> (i32, i32) {
    %c0_i32 = arith.constant 0 : i32
    %c0_i32_0 = arith.constant 0 : i32
    return %arg0, %c0_i32 : i32, i32
  }
}

</mosaic_0001>

<bundles_post_ra>
// kernel: tpu_custom_call.1
= control target key start
LH: loop header
LB: loop body
LE: loop exit
PB: predicated region body
PF: predicated region fallthrough
CT: control target
= control target key end

     0   :  { %10 = vsyncpa [#allocation3], 0  ;;  %v354_v5 = vmov 0.0   ;;  %vm44_vm0 = vcmask 1043456   ;;  %vm40_vm1 = vcmask 162816   ;;  %v30_v58 = vlaneseq  ;;  %s525_s0 = inlined_call_operand.vmem [shape: f32[2,20], index: 0, kind: input, shape index: {}]   ;;  %s526_s1 = inlined_call_operand.vmem [shape: f32[20,256], index: 1, kind: input, shape index: {}]   ;;  %s527_s2 = inlined_call_operand.vmem [shape: f32[1,256], index: 2, kind: input, shape index: {}]   ;;  %s528_s3 = inlined_call_operand.vmem [shape: f32[256,10], index: 3, kind: input, shape index: {}]   ;;  %s529_s4 = inlined_call_operand.vmem [shape: f32[1,10], index: 4, kind: input, shape index: {}]   ;;  %s530_s5 = inlined_call_operand.hbm [shape: f32[2,10], index: 5, kind: output, shape index: {}]  }
   0x1   :  { %v23_v0 = vld [vmem:[%s526_s1 + $0x8] sm:$0xff]  ;;  %v25_v1 = vld [vmem:[%s526_s1 + $0x18] sm:$0xff]  ;;  %v22_v3 = vld [vmem:[%s526_s1] sm:$0xff]  ;;  %115 = vmatprep.mubr.f32.mxu0 %v354_v5  ;;  %vm233_vm2 = vcmask 80896  }
   0x2   :  { %v290_v2 = vpack.c.bf16 %v25_v1, %v23_v0  ;;  %v24_v4 = vld [vmem:[%s526_s1 + $0x10] sm:$0xff]  ;;  %v27_v7 = vld [vmem:[%s526_s1 + $0x28] sm:$0xf]  ;;  %v140_v8 = vld [vmem:[%s528_s3 + $0x80] sm:$0xff]  ;;  %v31_v59 = vshrl.u32 %v30_v58, 7 }
   0x3   :  { %v292_v6 = vpack.c.bf16 %v24_v4, %v22_v3  ;;  %v26_v9 = vld [vmem:[%s526_s1 + $0x20] sm:$0xf]  ;;  %v141_v10 = vld [vmem:[%s528_s3 + $0x88] sm:$0xff]  ;;  %v142_v15 = vld [vmem:[%s528_s3 + $0x90] sm:$0xff] }
   0x4   :  { %291 = vmatprep.subr.bf16.mxu0 %v290_v2  ;;  %v124_v11 = vld [vmem:[%s528_s3] sm:$0xff]  ;;  %v125_v12 = vld [vmem:[%s528_s3 + $0x8] sm:$0xff]  ;;  %v294_v13 = vpack.c.bf16 %v141_v10, %v140_v8  ;;  %v143_v16 = vld [vmem:[%s528_s3 + $0x98] sm:$0xff]  ;;  %v32_v60 = vsub.s32 0, %v31_v59  ;;  %v36_v62 = vsub.s32 1, %v31_v59 }
   0x5   :  { %293 = vmatpush1.bf16.msra.mxu0 %v292_v6  ;;  %v296_v14 = vpack.c.bf16 %v125_v12, %v124_v11  ;;  %v126_v17 = vld [vmem:[%s528_s3 + $0x10] sm:$0xff]  ;;  %v298_v18 = vpack.c.bf16 %v143_v16, %v142_v15  ;;  %v127_v19 = vld [vmem:[%s528_s3 + $0x18] sm:$0xff]  ;;  %v144_v20 = vld [vmem:[%s528_s3 + $0xa0] sm:$0xff] }
   0x6   :  { %251 = vmatprep.subr.msk.mxu0 %vm44_vm0, %v27_v7  ;;  %v145_v21 = vld [vmem:[%s528_s3 + $0xa8] sm:$0xff]  ;;  %v21_v22 = vld [vmem:[%s525_s0] sm:$0xff]  ;;  %295 = vmatprep.subr.bf16.mxu1 %v294_v13  ;;  %v300_v23 = vpack.c.bf16 %v127_v19, %v126_v17  ;;  %v146_v27 = vld [vmem:[%s528_s3 + $0xb0] sm:$0xff] }
   0x7   :  { %297 = vmatpush3.bf16.msra.mxu1 %v296_v14  ;;  %v302_v24 = vpack.c.bf16 %v145_v21, %v144_v20  ;;  %v128_v25 = vld [vmem:[%s528_s3 + $0x20] sm:$0xff]  ;;  %v129_v26 = vld [vmem:[%s528_s3 + $0x28] sm:$0xff]  ;;  %v147_v28 = vld [vmem:[%s528_s3 + $0xb8] sm:$0xff] }
   0x8   :  { %299 = vmatprep.subr.bf16.mxu1 %v298_v18  ;;  %v304_v29 = vpack.c.bf16 %v129_v26, %v128_v25  ;;  %v306_v30 = vpack.c.bf16 %v147_v28, %v146_v27  ;;  %v130_v31 = vld [vmem:[%s528_s3 + $0x30] sm:$0xff]  ;;  %v131_v32 = vld [vmem:[%s528_s3 + $0x38] sm:$0xff]  ;;  %v148_v33 = vld [vmem:[%s528_s3 + $0xc0] sm:$0xff] }
   0x9   :  { %252 = vmatpush1.msk.msra.mxu0 %vm44_vm0, %v26_v9  ;;  %v149_v34 = vld [vmem:[%s528_s3 + $0xc8] sm:$0xff]  ;;  %v308_v35 = vpack.c.bf16 %v131_v32, %v130_v31  ;;  %v132_v37 = vld [vmem:[%s528_s3 + $0x40] sm:$0xff]  ;;  %v150_v39 = vld [vmem:[%s528_s3 + $0xd0] sm:$0xff] }
   0xa   :  { %253 = vmatmul.mubr.msk.f32.vlgmr.msra.gmra.mrb[0].mxu0 %vm40_vm1, %v21_v22  ;;  %v310_v36 = vpack.c.bf16 %v149_v34, %v148_v33  ;;  %v133_v38 = vld [vmem:[%s528_s3 + $0x48] sm:$0xff]  ;;  %v151_v40 = vld [vmem:[%s528_s3 + $0xd8] sm:$0xff]  ;;  %v134_v43 = vld [vmem:[%s528_s3 + $0x50] sm:$0xff] }
   0xb   :  { %301 = vmatpush3.bf16.msra.mxu1 %v300_v23  ;;  %v312_v41 = vpack.c.bf16 %v133_v38, %v132_v37  ;;  %v314_v42 = vpack.c.bf16 %v151_v40, %v150_v39  ;;  %v135_v44 = vld [vmem:[%s528_s3 + $0x58] sm:$0xff]  ;;  %v152_v45 = vld [vmem:[%s528_s3 + $0xe0] sm:$0xff]  ;;  %v153_v46 = vld [vmem:[%s528_s3 + $0xe8] sm:$0xff] }
   0xc   :  { %303 = vmatprep.subr.bf16.mxu1 %v302_v24  ;;  %v316_v47 = vpack.c.bf16 %v135_v44, %v134_v43  ;;  %v318_v48 = vpack.c.bf16 %v153_v46, %v152_v45  ;;  %v136_v49 = vld [vmem:[%s528_s3 + $0x60] sm:$0xff]  ;;  %v137_v50 = vld [vmem:[%s528_s3 + $0x68] sm:$0xff]  ;;  %v154_v52 = vld [vmem:[%s528_s3 + $0xf0] sm:$0xff] }
   0xd   :  { %v320_v51 = vpack.c.bf16 %v137_v50, %v136_v49  ;;  %v155_v53 = vld [vmem:[%s528_s3 + $0xf8] sm:$0xff]  ;;  %v138_v55 = vld [vmem:[%s528_s3 + $0x70] sm:$0xff]  ;;  %v28_v61 = vld [vmem:[%s527_s2] sm:$0x3] }
   0xe   :  { %v322_v54 = vpack.c.bf16 %v155_v53, %v154_v52  ;;  %v139_v56 = vld [vmem:[%s528_s3 + $0x78] sm:$0xff]  ;;  %v33_v63 = vrot.slane %v28_v61, %v32_v60  ;;  %v37_v0 = vrot.slane %v28_v61, %v36_v62  ;;  %v254_v8 = vld [vmem:[%s529_s4] ss:$0 sm:$0xff] }
   0xf   :  { %305 = vmatpush3.bf16.msra.mxu1 %v304_v29  ;;  %v324_v57 = vpack.c.bf16 %v139_v56, %v138_v55 }
  0x10   :  { %307 = vmatprep.subr.bf16.mxu1 %v306_v30 }
  0x13   :  { %309 = vmatpush3.bf16.msra.mxu1 %v308_v35 }
  0x14   :  { %311 = vmatprep.subr.bf16.mxu1 %v310_v36 }
  0x17   :  { %313 = vmatpush3.bf16.msra.mxu1 %v312_v41 }
  0x18   :  { %315 = vmatprep.subr.bf16.mxu1 %v314_v42 }
  0x1b   :  { %317 = vmatpush3.bf16.msra.mxu1 %v316_v47 }
  0x1c   :  { %319 = vmatprep.subr.bf16.mxu1 %v318_v48 }
  0x1f   :  { %321 = vmatpush3.bf16.msra.mxu1 %v320_v51 }
  0x20   :  { %323 = vmatprep.subr.bf16.mxu1 %v322_v54 }
  0x23   :  { %325 = vmatpush3.bf16.msra.mxu1 %v324_v57 }
  0xdd   :  { %v117_v1 = vpop.f32.mrb[0].mxu0 }
  0xde   :  { %v118_v2 = vadd.f32 %v117_v1, %v33_v63  ;;  %v119_v3 = vpop.f32.mrb[1].mxu0 }
  0xdf   :  { %v120_v4 = vadd.f32 %v119_v3, %v37_v0 }
  0xe0   :  { %v122_v6 = vmax.f32 %v118_v2, 0.0 }
  0xe1   :  { %v123_v5 = vmax.f32 %v120_v4, 0.0 }
  0xe3   :  { %227 = vmatprep.mubr.f32.mxu1 %v123_v5 }
  0xe4   :  { %228 = vmatmul.mubr.f32.vlgmr.msra.gmra.mrb[0].mxu1 %v122_v6 }
 0x1b7   :  { %v287_v7 = vpop.f32.mrb[0].mxu1 }
 0x1b8   :  { %v288_v9 = vpop.f32.mrb[1].mxu1 }
 0x1b9   :  { %v289_v10 = vadd.f32 %v288_v9, %v287_v7 }
 0x1bb   :  { %v230_v11 = vadd.f32 %v289_v10, %v254_v8 }
 0x1bd   :  { %234 = vst.msk [vmem:[#allocation2] sm:$0xff] %vm233_vm2, %v230_v11 }
 0x1be   :  { %239 = vsyncadd [#allocation3], 96  ;;  %s355_s2 = smov [#allocation2]  }
 0x1bf   :  { %s240_s19 = sshll.u32 %s355_s2, 4  ;;  %s241_s19 = int_to_ptr.vmem [resolvable:$true] %s240_s19 }
 0x1c0   :  { %s330_s20 = scalar_lea.vmem %s241_s19, 32  ;;  %s334_s21 = scalar_lea.vmem %s241_s19, 128 }
 0x1c1   :  { %p331_p0 = scmp.ne.s32.totalorder %s241_s19, %s330_s20  ;;  %p335_p1 = scmp.lt.s32.totalorder %s241_s19, %s241_s19 }
 0x1c2   :  { %p336_p2 = scmp.lt.s32.totalorder %s334_s21, %s330_s20 }
 0x1c4   :  { %p337_p3 = por %p336_p2, %p335_p1 }
 0x1c6   :  { %p338_p4 = pnand %p337_p3, %p331_p0 }
 0x1c8   :  { %341 = shalt.err (!%p338_p4)
}
 0x1c9   :  { %s342_s4 = scalar_lea.hbm %s530_s5, 32 }
 0x1ca   :  { %p343_p5 = scmp.ne.s32.totalorder %s530_s5, %s342_s4  ;;  %p346_p6 = scmp.lt.u32.totalorder %s342_s4, %s530_s5 }
 0x1cc   :  { %p348_p7 = pnand %p346_p6, %p343_p5 }
 0x1ce   :  { %351 = shalt.err (!%p348_p7)
}
 0x1cf   :  { %s356_s28 = smov 32   ;;  %s357_s29 = smov 2  }
 0x1d0   :  { %246 = dma.vmem_to_hbm [thread:$0]  %s241_s19, 32, %s530_s5, [#allocation3], %s356_s28, %s356_s28, %s357_s29  }
 0x1d1   :  { %352 = dma.done.wait [#allocation3], 128  }
 0x1d2   :  { %353 = vsyncadd [#allocation3], 4294967168 }
 0x1d3   :  { %250 = vsyncpa [#allocation3], 1 }

</bundles_post_ra>
